<compile_context>
chip_gen: v6e
topology: v6e:2x2x1
jax: 0.10.0
libtpu: 0.0.40
codegen_flags: <defaults>
</compile_context>

<pallas_src>
import jax
import jax.numpy as jnp
from jax import lax
from jax.experimental import pallas as pl
from jax.experimental.pallas import tpu as pltpu

EPS = 1e-5


def _fold_bn(bn):
    gamma, beta, mean, var = bn
    scale = gamma / jnp.sqrt(var + EPS)
    return scale, beta - mean * scale


# ----------------------------------------------------------------------------
# ResidualBlock forward (single fused Pallas kernel)
# ----------------------------------------------------------------------------
def residual_block_pallas(x, params, stride, out_dtype=jnp.float32):
    """x: (N, Cin, H, W) f32  ->  (N, Cout, Ho, Wo) out_dtype (NCHW)."""
    if stride not in (1, 2):
        raise NotImplementedError("stride must be 1 or 2")
    N, Cin, H, W = x.shape
    Cout = params["w1"].shape[0]
    Ho = (H - 1) // stride + 1
    Wo = (W - 1) // stride + 1
    Hop, Wop = Ho + 2, Wo + 2          # conv2-input (zero-padded out1) grid
    M = Hop * Wop                      # flat padded-grid length (all output positions)
    G = Wop + 1                        # zero guard so every 3x3 tap is a static slice
    Lg = M + 2 * G
    has_proj = (stride != 1) or (Cin != Cout)

    # ---- activation phase planes (wrapper side; ~same total bytes as x) -------
    if stride == 1:
        xpad = jnp.pad(x, ((0, 0), (0, 0), (1, 1), (1, 1)))        # (N,Cin,Hop,Wop)
        flat = xpad.reshape(N, Cin, M)
        phases = [jnp.pad(flat, ((0, 0), (0, 0), (G, G))).astype(jnp.bfloat16)]
        # conv1 tap (kh,kw) reads phase 0, guarded-slice start = kh*Wop + kw
        conv1_taps = [(0, kh * Wop + kw) for kh in range(3) for kw in range(3)]
        proj_phase, ident_phase = 0, 0
    else:
        # space-to-depth: phase[a,b][r,c] = xpad[2r-2+a, 2c-2+b] (zero where OOB)
        xbig = jnp.pad(x, ((0, 0), (0, 0), (3, 3), (3, 3)))
        phases = []
        for a in range(2):
            for b in range(2):
                ph = xbig[:, :, a:a + 2 * Hop - 1:2, b:b + 2 * Wop - 1:2]
                phases.append(jnp.pad(ph.reshape(N, Cin, M),
                                      ((0, 0), (0, 0), (G, G))).astype(jnp.bfloat16))
        # conv1 tap (kh,kw) reads phase (kh%2, kw%2) at start = G + (kh//2)*Wop + kw//2
        conv1_taps = [((kh % 2) * 2 + (kw % 2), G + (kh // 2) * Wop + (kw // 2))
                      for kh in range(3) for kw in range(3)]
        proj_phase, ident_phase = 3, None
    P = len(phases)

    # ---- fold BN scales into conv weights; per-channel shifts passed separately
    sc1, sh1 = _fold_bn(params["bn1"])
    w1t = (jnp.transpose(params["w1"], (2, 3, 0, 1)).reshape(9, Cout, Cin)
           * sc1[None, :, None]).astype(jnp.bfloat16)
    sc2, sh2 = _fold_bn(params["bn2"])
    w2t = (jnp.transpose(params["w2"], (2, 3, 0, 1)).reshape(9, Cout, Cout)
           * sc2[None, :, None]).astype(jnp.bfloat16)
    shift2 = sh2
    ws = None
    if has_proj:
        scs, shs = _fold_bn(params["bns"])
        ws = (params["ws"].reshape(Cout, Cin) * scs[:, None]).astype(jnp.bfloat16)
        shift2 = sh2 + shs

    # interior mask = conv2's zero-padding ring on the out1 grid (tiny, const stream)
    rr = jnp.arange(Hop)
    cc = jnp.arange(Wop)
    interior = (((rr >= 1) & (rr <= Ho))[:, None]
                & ((cc >= 1) & (cc <= Wo))[None, :])
    mask = interior.reshape(1, M).astype(jnp.float32)

    # ---- the fused kernel -------------------------------------------------------
    def kernel(*refs):
        out1_buf = refs[-1]                       # (Cout, Lg) bf16 VMEM scratch
        o_ref = refs[-2]                          # (1, Cout, M)
        ins = refs[:-2]
        w1_ref, w2_ref = ins[P], ins[P + 1]
        sh1_ref, sh2_ref, mask_ref = ins[P + 2], ins[P + 3], ins[P + 4]
        ws_ref = ins[P + 5] if has_proj else None

        # conv1 + bn1 + relu: 9 shifted-view matmuls, f32 accumulation (no im2col)
        acc1 = jnp.zeros((Cout, M), jnp.float32)
        for t, (ph_i, start) in enumerate(conv1_taps):
            xs = ins[ph_i][0, :, start:start + M]                 # (Cin, M) bf16
            acc1 = acc1 + jnp.dot(w1_ref[t], xs,
                                  preferred_element_type=jnp.float32)
        out1 = jnp.maximum(acc1 + sh1_ref[...], 0.0) * mask_ref[...]

        # out1 stays resident in VMEM (guarded flat layout) -> conv2 taps read it here
        out1_buf[...] = jnp.zeros(out1_buf.shape, out1_buf.dtype)
        out1_buf[:, G:G + M] = out1.astype(out1_buf.dtype)

        # conv2 + bn2: 9 shifted-view matmuls over the VMEM-resident out1
        acc2 = jnp.zeros((Cout, M), jnp.float32)
        for kh in range(3):
            for kw in range(3):
                start = kh * Wop + kw
                acc2 = acc2 + jnp.dot(w2_ref[kh * 3 + kw],
                                      out1_buf[:, start:start + M],
                                      preferred_element_type=jnp.float32)
        y = acc2 + sh2_ref[...]

        # shortcut: reuses the conv1 input planes -> zero extra HBM streams
        if has_proj:
            y = y + jnp.dot(ws_ref[...], ins[proj_phase][0, :, G:G + M],
                            preferred_element_type=jnp.float32)
        else:
            # TODO(synk): identity shortcut added from the bf16 conv-input stream;
            # stream an f32 copy if a bit-faithful residual is required.
            y = y + ins[ident_phase][0, :, G:G + M].astype(jnp.float32)

        o_ref[0] = jnp.maximum(y, 0.0).astype(o_ref.dtype)

    in_specs = ([pl.BlockSpec((1, Cin, Lg), lambda n: (n, 0, 0)) for _ in range(P)]
                + [pl.BlockSpec((9, Cout, Cin), lambda n: (0, 0, 0)),   # const streams:
                   pl.BlockSpec((9, Cout, Cout), lambda n: (0, 0, 0)),  # fetched once
                   pl.BlockSpec((Cout, 1), lambda n: (0, 0)),
                   pl.BlockSpec((Cout, 1), lambda n: (0, 0)),
                   pl.BlockSpec((1, M), lambda n: (0, 0))])
    args = phases + [w1t, w2t,
                     sh1.reshape(Cout, 1).astype(jnp.float32),
                     shift2.reshape(Cout, 1).astype(jnp.float32),
                     mask]
    if has_proj:
        in_specs.append(pl.BlockSpec((Cout, Cin), lambda n: (0, 0)))
        args.append(ws)

    out_flat = pl.pallas_call(
        kernel,
        out_shape=jax.ShapeDtypeStruct((N, Cout, M), out_dtype),
        grid=(N,),                                  # batch-parallel (megacore on v7x)
        in_specs=in_specs,
        out_specs=pl.BlockSpec((1, Cout, M), lambda n: (n, 0, 0)),
        scratch_shapes=[pltpu.VMEM((Cout, Lg), jnp.bfloat16)],
        compiler_params=pltpu.CompilerParams(
            dimension_semantics=("parallel",)),
    )(*args)

    # drop the padded-grid ring -> (N, Cout, Ho, Wo) NCHW; no transposes needed
    return out_flat.reshape(N, Cout, Hop, Wop)[:, :, 1:Ho + 1, 1:Wo + 1]


# ----------------------------------------------------------------------------
# Pure-JAX f32 reference (NCHW, eval-mode BN) for validation
# ----------------------------------------------------------------------------
def residual_block_ref(x, params, stride):
    def conv(x, w, s, p):
        return lax.conv_general_dilated(
            x, w, (s, s), ((p, p), (p, p)),
            dimension_numbers=("NCHW", "OIHW", "NCHW"))

    def bn(x, prm):
        gamma, beta, mean, var = prm
        inv = gamma / jnp.sqrt(var + EPS)
        return (x - mean[None, :, None, None]) * inv[None, :, None, None] \
               + beta[None, :, None, None]

    Cin = x.shape[1]
    Cout = params["w1"].shape[0]
    out = jax.nn.relu(bn(conv(x, params["w1"], stride, 1), params["bn1"]))
    out = bn(conv(out, params["w2"], 1, 1), params["bn2"])
    if stride != 1 or Cin != Cout:
        short = bn(conv(x, params["ws"], stride, 0), params["bns"])
    else:
        short = x
    return jax.nn.relu(out + short)


# ----------------------------------------------------------------------------
def make_params(key, in_channels, out_channels, need_shortcut):
    ks = jax.random.split(key, 16)

    def bn_params(k):
        k0, k1, k2, k3 = jax.random.split(k, 4)
        gamma = jax.random.uniform(k0, (out_channels,), jnp.float32, 0.5, 1.5)
        beta = jax.random.normal(k1, (out_channels,), jnp.float32) * 0.1
        mean = jax.random.normal(k2, (out_channels,), jnp.float32) * 0.1
        var = jax.random.uniform(k3, (out_channels,), jnp.float32, 0.5, 1.5)
        return (gamma, beta, mean, var)

    params = {
        "w1": jax.random.normal(ks[0], (out_channels, in_channels, 3, 3), jnp.float32) * 0.1,
        "bn1": bn_params(ks[1]),
        "w2": jax.random.normal(ks[2], (out_channels, out_channels, 3, 3), jnp.float32) * 0.1,
        "bn2": bn_params(ks[3]),
    }
    if need_shortcut:
        params["ws"] = jax.random.normal(ks[4], (out_channels, in_channels, 1, 1), jnp.float32) * 0.1
        params["bns"] = bn_params(ks[5])
    return params


if __name__ == "__main__":
    key = jax.random.PRNGKey(0)

    # Two small configs exercising both shortcut paths:
    #   (N, Cin, H, W, Cout, stride)
    configs = [
        (2, 4, 16, 16, 8, 2),   # projection shortcut (stride != 1, Cin != Cout)
        (2, 8, 16, 16, 8, 1),   # identity shortcut
    ]
    for idx, (N, Cin, H, W, Cout, stride) in enumerate(configs):
        kx, kp = jax.random.split(jax.random.fold_in(key, idx))
        x = jax.random.normal(kx, (N, Cin, H, W), jnp.float32)
        params = make_params(kp, Cin, Cout,
                             need_shortcut=(stride != 1 or Cin != Cout))

        out_pallas = jax.block_until_ready(residual_block_pallas(x, params, stride))
        out_ref = jax.block_until_ready(residual_block_ref(x, params, stride))

        Ho = (H - 1) // stride + 1
        Wo = (W - 1) // stride + 1
        assert out_pallas.shape == (N, Cout, Ho, Wo), out_pallas.shape
        # bf16 MXU inputs -> compare against the f32 reference with a looser tolerance.
        max_err = float(jnp.max(jnp.abs(out_pallas - out_ref)))
        assert jnp.allclose(out_pallas, out_ref, rtol=3e-2, atol=3e-2), (idx, max_err)

    print("KERNEL_OK")
</pallas_src>

<mosaic_0001>
module attributes {stable_mosaic.version = 11 : i64} {
  func.func @kernel(%arg0: i32, %arg1: memref<1x4x122xbf16, #tpu.memory_space<vmem>>, %arg2: memref<1x4x122xbf16, #tpu.memory_space<vmem>>, %arg3: memref<1x4x122xbf16, #tpu.memory_space<vmem>>, %arg4: memref<1x4x122xbf16, #tpu.memory_space<vmem>>, %arg5: memref<9x8x4xbf16, #tpu.memory_space<vmem>>, %arg6: memref<9x8x8xbf16, #tpu.memory_space<vmem>>, %arg7: memref<8x1xf32, #tpu.memory_space<vmem>>, %arg8: memref<8x1xf32, #tpu.memory_space<vmem>>, %arg9: memref<1x100xf32, #tpu.memory_space<vmem>>, %arg10: memref<8x4xbf16, #tpu.memory_space<vmem>>, %arg11: memref<1x8x100xf32, #tpu.memory_space<vmem>>, %arg12: memref<8x122xbf16, #tpu.memory_space<vmem>>) attributes {dimension_semantics = [#tpu.dimension_semantics<parallel>], iteration_bounds = array<i64: 2>, scalar_prefetch = 0 : i64, scratch_operands = 1 : i64, tpu.core_type = #tpu.core_type<tc>, window_params = [{transform_indices = @transform_0, window_bounds = array<i64: 1, 4, 122>}, {transform_indices = @transform_1, window_bounds = array<i64: 1, 4, 122>}, {transform_indices = @transform_2, window_bounds = array<i64: 1, 4, 122>}, {transform_indices = @transform_3, window_bounds = array<i64: 1, 4, 122>}, {pipeline_mode = #tpu.pipeline_mode<synchronous>, transform_indices = @transform_4, window_bounds = array<i64: 9, 8, 4>}, {pipeline_mode = #tpu.pipeline_mode<synchronous>, transform_indices = @transform_5, window_bounds = array<i64: 9, 8, 8>}, {pipeline_mode = #tpu.pipeline_mode<synchronous>, transform_indices = @transform_6, window_bounds = array<i64: 8, 1>}, {pipeline_mode = #tpu.pipeline_mode<synchronous>, transform_indices = @transform_7, window_bounds = array<i64: 8, 1>}, {pipeline_mode = #tpu.pipeline_mode<synchronous>, transform_indices = @transform_8, window_bounds = array<i64: 1, 100>}, {pipeline_mode = #tpu.pipeline_mode<synchronous>, transform_indices = @transform_9, window_bounds = array<i64: 8, 4>}, {transform_indices = @transform_10, window_bounds = array<i64: 1, 8, 100>}]} {
    %cst = arith.constant 0.000000e+00 : f32
    %0 = vector.broadcast %cst : f32 to vector<8x100xf32>
    %c0 = arith.constant 0 : index
    %c0_0 = arith.constant 0 : index
    %c11 = arith.constant 11 : index
    %1 = vector.load %arg1[%c0, %c0_0, %c11] : memref<1x4x122xbf16, #tpu.memory_space<vmem>>, vector<1x4x100xbf16>
    %2 = vector.shape_cast %1 : vector<1x4x100xbf16> to vector<4x100xbf16>
    %c0_1 = arith.constant 0 : index
    %c0_2 = arith.constant 0 : index
    %c0_3 = arith.constant 0 : index
    %3 = vector.load %arg5[%c0_1, %c0_2, %c0_3] : memref<9x8x4xbf16, #tpu.memory_space<vmem>>, vector<1x8x4xbf16>
    %4 = vector.shape_cast %3 : vector<1x8x4xbf16> to vector<8x4xbf16>
    %cst_4 = arith.constant dense<0.000000e+00> : vector<8x100xf32>
    %5 = tpu.matmul %4, %2, %cst_4 {dimension_numbers = #tpu.dot_dimension_numbers<[1], [0], [0], [1], [0, 0, 1, 1], [], []>} : vector<8x4xbf16>, vector<4x100xbf16>, vector<8x100xf32> -> vector<8x100xf32>
    %6 = arith.addf %0, %5 : vector<8x100xf32>
    %c0_5 = arith.constant 0 : index
    %c0_6 = arith.constant 0 : index
    %c11_7 = arith.constant 11 : index
    %7 = vector.load %arg2[%c0_5, %c0_6, %c11_7] : memref<1x4x122xbf16, #tpu.memory_space<vmem>>, vector<1x4x100xbf16>
    %8 = vector.shape_cast %7 : vector<1x4x100xbf16> to vector<4x100xbf16>
    %c1 = arith.constant 1 : index
    %c0_8 = arith.constant 0 : index
    %c0_9 = arith.constant 0 : index
    %9 = vector.load %arg5[%c1, %c0_8, %c0_9] : memref<9x8x4xbf16, #tpu.memory_space<vmem>>, vector<1x8x4xbf16>
    %10 = vector.shape_cast %9 : vector<1x8x4xbf16> to vector<8x4xbf16>
    %cst_10 = arith.constant dense<0.000000e+00> : vector<8x100xf32>
    %11 = tpu.matmul %10, %8, %cst_10 {dimension_numbers = #tpu.dot_dimension_numbers<[1], [0], [0], [1], [0, 0, 1, 1], [], []>} : vector<8x4xbf16>, vector<4x100xbf16>, vector<8x100xf32> -> vector<8x100xf32>
    %12 = arith.addf %6, %11 : vector<8x100xf32>
    %c0_11 = arith.constant 0 : index
    %c0_12 = arith.constant 0 : index
    %c12 = arith.constant 12 : index
    %13 = vector.load %arg1[%c0_11, %c0_12, %c12] : memref<1x4x122xbf16, #tpu.memory_space<vmem>>, vector<1x4x100xbf16>
    %14 = vector.shape_cast %13 : vector<1x4x100xbf16> to vector<4x100xbf16>
    %c2 = arith.constant 2 : index
    %c0_13 = arith.constant 0 : index
    %c0_14 = arith.constant 0 : index
    %15 = vector.load %arg5[%c2, %c0_13, %c0_14] : memref<9x8x4xbf16, #tpu.memory_space<vmem>>, vector<1x8x4xbf16>
    %16 = vector.shape_cast %15 : vector<1x8x4xbf16> to vector<8x4xbf16>
    %cst_15 = arith.constant dense<0.000000e+00> : vector<8x100xf32>
    %17 = tpu.matmul %16, %14, %cst_15 {dimension_numbers = #tpu.dot_dimension_numbers<[1], [0], [0], [1], [0, 0, 1, 1], [], []>} : vector<8x4xbf16>, vector<4x100xbf16>, vector<8x100xf32> -> vector<8x100xf32>
    %18 = arith.addf %12, %17 : vector<8x100xf32>
    %c0_16 = arith.constant 0 : index
    %c0_17 = arith.constant 0 : index
    %c11_18 = arith.constant 11 : index
    %19 = vector.load %arg3[%c0_16, %c0_17, %c11_18] : memref<1x4x122xbf16, #tpu.memory_space<vmem>>, vector<1x4x100xbf16>
    %20 = vector.shape_cast %19 : vector<1x4x100xbf16> to vector<4x100xbf16>
    %c3 = arith.constant 3 : index
    %c0_19 = arith.constant 0 : index
    %c0_20 = arith.constant 0 : index
    %21 = vector.load %arg5[%c3, %c0_19, %c0_20] : memref<9x8x4xbf16, #tpu.memory_space<vmem>>, vector<1x8x4xbf16>
    %22 = vector.shape_cast %21 : vector<1x8x4xbf16> to vector<8x4xbf16>
    %cst_21 = arith.constant dense<0.000000e+00> : vector<8x100xf32>
    %23 = tpu.matmul %22, %20, %cst_21 {dimension_numbers = #tpu.dot_dimension_numbers<[1], [0], [0], [1], [0, 0, 1, 1], [], []>} : vector<8x4xbf16>, vector<4x100xbf16>, vector<8x100xf32> -> vector<8x100xf32>
    %24 = arith.addf %18, %23 : vector<8x100xf32>
    %c0_22 = arith.constant 0 : index
    %c0_23 = arith.constant 0 : index
    %c11_24 = arith.constant 11 : index
    %25 = vector.load %arg4[%c0_22, %c0_23, %c11_24] : memref<1x4x122xbf16, #tpu.memory_space<vmem>>, vector<1x4x100xbf16>
    %26 = vector.shape_cast %25 : vector<1x4x100xbf16> to vector<4x100xbf16>
    %c4 = arith.constant 4 : index
    %c0_25 = arith.constant 0 : index
    %c0_26 = arith.constant 0 : index
    %27 = vector.load %arg5[%c4, %c0_25, %c0_26] : memref<9x8x4xbf16, #tpu.memory_space<vmem>>, vector<1x8x4xbf16>
    %28 = vector.shape_cast %27 : vector<1x8x4xbf16> to vector<8x4xbf16>
    %cst_27 = arith.constant dense<0.000000e+00> : vector<8x100xf32>
    %29 = tpu.matmul %28, %26, %cst_27 {dimension_numbers = #tpu.dot_dimension_numbers<[1], [0], [0], [1], [0, 0, 1, 1], [], []>} : vector<8x4xbf16>, vector<4x100xbf16>, vector<8x100xf32> -> vector<8x100xf32>
    %30 = arith.addf %24, %29 : vector<8x100xf32>
    %c0_28 = arith.constant 0 : index
    %c0_29 = arith.constant 0 : index
    %c12_30 = arith.constant 12 : index
    %31 = vector.load %arg3[%c0_28, %c0_29, %c12_30] : memref<1x4x122xbf16, #tpu.memory_space<vmem>>, vector<1x4x100xbf16>
    %32 = vector.shape_cast %31 : vector<1x4x100xbf16> to vector<4x100xbf16>
    %c5 = arith.constant 5 : index
    %c0_31 = arith.constant 0 : index
    %c0_32 = arith.constant 0 : index
    %33 = vector.load %arg5[%c5, %c0_31, %c0_32] : memref<9x8x4xbf16, #tpu.memory_space<vmem>>, vector<1x8x4xbf16>
    %34 = vector.shape_cast %33 : vector<1x8x4xbf16> to vector<8x4xbf16>
    %cst_33 = arith.constant dense<0.000000e+00> : vector<8x100xf32>
    %35 = tpu.matmul %34, %32, %cst_33 {dimension_numbers = #tpu.dot_dimension_numbers<[1], [0], [0], [1], [0, 0, 1, 1], [], []>} : vector<8x4xbf16>, vector<4x100xbf16>, vector<8x100xf32> -> vector<8x100xf32>
    %36 = arith.addf %30, %35 : vector<8x100xf32>
    %c0_34 = arith.constant 0 : index
    %c0_35 = arith.constant 0 : index
    %c21 = arith.constant 21 : index
    %37 = vector.load %arg1[%c0_34, %c0_35, %c21] : memref<1x4x122xbf16, #tpu.memory_space<vmem>>, vector<1x4x100xbf16>
    %38 = vector.shape_cast %37 : vector<1x4x100xbf16> to vector<4x100xbf16>
    %c6 = arith.constant 6 : index
    %c0_36 = arith.constant 0 : index
    %c0_37 = arith.constant 0 : index
    %39 = vector.load %arg5[%c6, %c0_36, %c0_37] : memref<9x8x4xbf16, #tpu.memory_space<vmem>>, vector<1x8x4xbf16>
    %40 = vector.shape_cast %39 : vector<1x8x4xbf16> to vector<8x4xbf16>
    %cst_38 = arith.constant dense<0.000000e+00> : vector<8x100xf32>
    %41 = tpu.matmul %40, %38, %cst_38 {dimension_numbers = #tpu.dot_dimension_numbers<[1], [0], [0], [1], [0, 0, 1, 1], [], []>} : vector<8x4xbf16>, vector<4x100xbf16>, vector<8x100xf32> -> vector<8x100xf32>
    %42 = arith.addf %36, %41 : vector<8x100xf32>
    %c0_39 = arith.constant 0 : index
    %c0_40 = arith.constant 0 : index
    %c21_41 = arith.constant 21 : index
    %43 = vector.load %arg2[%c0_39, %c0_40, %c21_41] : memref<1x4x122xbf16, #tpu.memory_space<vmem>>, vector<1x4x100xbf16>
    %44 = vector.shape_cast %43 : vector<1x4x100xbf16> to vector<4x100xbf16>
    %c7 = arith.constant 7 : index
    %c0_42 = arith.constant 0 : index
    %c0_43 = arith.constant 0 : index
    %45 = vector.load %arg5[%c7, %c0_42, %c0_43] : memref<9x8x4xbf16, #tpu.memory_space<vmem>>, vector<1x8x4xbf16>
    %46 = vector.shape_cast %45 : vector<1x8x4xbf16> to vector<8x4xbf16>
    %cst_44 = arith.constant dense<0.000000e+00> : vector<8x100xf32>
    %47 = tpu.matmul %46, %44, %cst_44 {dimension_numbers = #tpu.dot_dimension_numbers<[1], [0], [0], [1], [0, 0, 1, 1], [], []>} : vector<8x4xbf16>, vector<4x100xbf16>, vector<8x100xf32> -> vector<8x100xf32>
    %48 = arith.addf %42, %47 : vector<8x100xf32>
    %c0_45 = arith.constant 0 : index
    %c0_46 = arith.constant 0 : index
    %c22 = arith.constant 22 : index
    %49 = vector.load %arg1[%c0_45, %c0_46, %c22] : memref<1x4x122xbf16, #tpu.memory_space<vmem>>, vector<1x4x100xbf16>
    %50 = vector.shape_cast %49 : vector<1x4x100xbf16> to vector<4x100xbf16>
    %c8 = arith.constant 8 : index
    %c0_47 = arith.constant 0 : index
    %c0_48 = arith.constant 0 : index
    %51 = vector.load %arg5[%c8, %c0_47, %c0_48] : memref<9x8x4xbf16, #tpu.memory_space<vmem>>, vector<1x8x4xbf16>
    %52 = vector.shape_cast %51 : vector<1x8x4xbf16> to vector<8x4xbf16>
    %cst_49 = arith.constant dense<0.000000e+00> : vector<8x100xf32>
    %53 = tpu.matmul %52, %50, %cst_49 {dimension_numbers = #tpu.dot_dimension_numbers<[1], [0], [0], [1], [0, 0, 1, 1], [], []>} : vector<8x4xbf16>, vector<4x100xbf16>, vector<8x100xf32> -> vector<8x100xf32>
    %54 = arith.addf %48, %53 : vector<8x100xf32>
    %c0_50 = arith.constant 0 : index
    %c0_51 = arith.constant 0 : index
    %55 = vector.load %arg7[%c0_50, %c0_51] : memref<8x1xf32, #tpu.memory_space<vmem>>, vector<8x1xf32>
    %56 = vector.broadcast %55 : vector<8x1xf32> to vector<8x100xf32>
    %57 = arith.addf %54, %56 : vector<8x100xf32>
    %cst_52 = arith.constant 0.000000e+00 : f32
    %58 = vector.broadcast %cst_52 : f32 to vector<8x100xf32>
    %59 = arith.maximumf %57, %58 : vector<8x100xf32>
    %c0_53 = arith.constant 0 : index
    %c0_54 = arith.constant 0 : index
    %60 = vector.load %arg9[%c0_53, %c0_54] : memref<1x100xf32, #tpu.memory_space<vmem>>, vector<1x100xf32>
    %61 = vector.broadcast %60 : vector<1x100xf32> to vector<8x100xf32>
    %62 = arith.mulf %59, %61 : vector<8x100xf32>
    %cst_55 = arith.constant 0.000000e+00 : bf16
    %63 = vector.broadcast %cst_55 : bf16 to vector<8x122xbf16>
    %c0_56 = arith.constant 0 : index
    %c0_57 = arith.constant 0 : index
    %64 = vector.load %arg12[%c0_56, %c0_57] : memref<8x122xbf16, #tpu.memory_space<vmem>>, vector<8x122xbf16>
    tpu.vector_store %arg12[%c0_56, %c0_57], %63 {strides = array<i32>} : memref<8x122xbf16, #tpu.memory_space<vmem>>, vector<8x122xbf16>,
    %65 = arith.truncf %62 : vector<8x100xf32> to vector<8x100xbf16>
    %c0_58 = arith.constant 0 : index
    %c11_59 = arith.constant 11 : index
    %66 = vector.load %arg12[%c0_58, %c11_59] : memref<8x122xbf16, #tpu.memory_space<vmem>>, vector<8x100xbf16>
    tpu.vector_store %arg12[%c0_58, %c11_59], %65 {strides = array<i32>} : memref<8x122xbf16, #tpu.memory_space<vmem>>, vector<8x100xbf16>,
    %cst_60 = arith.constant 0.000000e+00 : f32
    %67 = vector.broadcast %cst_60 : f32 to vector<8x100xf32>
    %c0_61 = arith.constant 0 : index
    %c0_62 = arith.constant 0 : index
    %c0_63 = arith.constant 0 : index
    %68 = vector.load %arg6[%c0_61, %c0_62, %c0_63] : memref<9x8x8xbf16, #tpu.memory_space<vmem>>, vector<1x8x8xbf16>
    %69 = vector.shape_cast %68 : vector<1x8x8xbf16> to vector<8x8xbf16>
    %c0_64 = arith.constant 0 : index
    %c0_65 = arith.constant 0 : index
    %70 = vector.load %arg12[%c0_64, %c0_65] : memref<8x122xbf16, #tpu.memory_space<vmem>>, vector<8x100xbf16>
    %cst_66 = arith.constant dense<0.000000e+00> : vector<8x100xf32>
    %71 = tpu.matmul %69, %70, %cst_66 {dimension_numbers = #tpu.dot_dimension_numbers<[1], [0], [0], [1], [0, 0, 1, 1], [], []>} : vector<8x8xbf16>, vector<8x100xbf16>, vector<8x100xf32> -> vector<8x100xf32>
    %72 = arith.addf %67, %71 : vector<8x100xf32>
    %c1_67 = arith.constant 1 : index
    %c0_68 = arith.constant 0 : index
    %c0_69 = arith.constant 0 : index
    %73 = vector.load %arg6[%c1_67, %c0_68, %c0_69] : memref<9x8x8xbf16, #tpu.memory_space<vmem>>, vector<1x8x8xbf16>
    %74 = vector.shape_cast %73 : vector<1x8x8xbf16> to vector<8x8xbf16>
    %c0_70 = arith.constant 0 : index
    %c1_71 = arith.constant 1 : index
    %75 = vector.load %arg12[%c0_70, %c1_71] : memref<8x122xbf16, #tpu.memory_space<vmem>>, vector<8x100xbf16>
    %cst_72 = arith.constant dense<0.000000e+00> : vector<8x100xf32>
    %76 = tpu.matmul %74, %75, %cst_72 {dimension_numbers = #tpu.dot_dimension_numbers<[1], [0], [0], [1], [0, 0, 1, 1], [], []>} : vector<8x8xbf16>, vector<8x100xbf16>, vector<8x100xf32> -> vector<8x100xf32>
    %77 = arith.addf %72, %76 : vector<8x100xf32>
    %c2_73 = arith.constant 2 : index
    %c0_74 = arith.constant 0 : index
    %c0_75 = arith.constant 0 : index
    %78 = vector.load %arg6[%c2_73, %c0_74, %c0_75] : memref<9x8x8xbf16, #tpu.memory_space<vmem>>, vector<1x8x8xbf16>
    %79 = vector.shape_cast %78 : vector<1x8x8xbf16> to vector<8x8xbf16>
    %c0_76 = arith.constant 0 : index
    %c2_77 = arith.constant 2 : index
    %80 = vector.load %arg12[%c0_76, %c2_77] : memref<8x122xbf16, #tpu.memory_space<vmem>>, vector<8x100xbf16>
    %cst_78 = arith.constant dense<0.000000e+00> : vector<8x100xf32>
    %81 = tpu.matmul %79, %80, %cst_78 {dimension_numbers = #tpu.dot_dimension_numbers<[1], [0], [0], [1], [0, 0, 1, 1], [], []>} : vector<8x8xbf16>, vector<8x100xbf16>, vector<8x100xf32> -> vector<8x100xf32>
    %82 = arith.addf %77, %81 : vector<8x100xf32>
    %c3_79 = arith.constant 3 : index
    %c0_80 = arith.constant 0 : index
    %c0_81 = arith.constant 0 : index
    %83 = vector.load %arg6[%c3_79, %c0_80, %c0_81] : memref<9x8x8xbf16, #tpu.memory_space<vmem>>, vector<1x8x8xbf16>
    %84 = vector.shape_cast %83 : vector<1x8x8xbf16> to vector<8x8xbf16>
    %c0_82 = arith.constant 0 : index
    %c10 = arith.constant 10 : index
    %85 = vector.load %arg12[%c0_82, %c10] : memref<8x122xbf16, #tpu.memory_space<vmem>>, vector<8x100xbf16>
    %cst_83 = arith.constant dense<0.000000e+00> : vector<8x100xf32>
    %86 = tpu.matmul %84, %85, %cst_83 {dimension_numbers = #tpu.dot_dimension_numbers<[1], [0], [0], [1], [0, 0, 1, 1], [], []>} : vector<8x8xbf16>, vector<8x100xbf16>, vector<8x100xf32> -> vector<8x100xf32>
    %87 = arith.addf %82, %86 : vector<8x100xf32>
    %c4_84 = arith.constant 4 : index
    %c0_85 = arith.constant 0 : index
    %c0_86 = arith.constant 0 : index
    %88 = vector.load %arg6[%c4_84, %c0_85, %c0_86] : memref<9x8x8xbf16, #tpu.memory_space<vmem>>, vector<1x8x8xbf16>
    %89 = vector.shape_cast %88 : vector<1x8x8xbf16> to vector<8x8xbf16>
    %c0_87 = arith.constant 0 : index
    %c11_88 = arith.constant 11 : index
    %90 = vector.load %arg12[%c0_87, %c11_88] : memref<8x122xbf16, #tpu.memory_space<vmem>>, vector<8x100xbf16>
    %cst_89 = arith.constant dense<0.000000e+00> : vector<8x100xf32>
    %91 = tpu.matmul %89, %90, %cst_89 {dimension_numbers = #tpu.dot_dimension_numbers<[1], [0], [0], [1], [0, 0, 1, 1], [], []>} : vector<8x8xbf16>, vector<8x100xbf16>, vector<8x100xf32> -> vector<8x100xf32>
    %92 = arith.addf %87, %91 : vector<8x100xf32>
    %c5_90 = arith.constant 5 : index
    %c0_91 = arith.constant 0 : index
    %c0_92 = arith.constant 0 : index
    %93 = vector.load %arg6[%c5_90, %c0_91, %c0_92] : memref<9x8x8xbf16, #tpu.memory_space<vmem>>, vector<1x8x8xbf16>
    %94 = vector.shape_cast %93 : vector<1x8x8xbf16> to vector<8x8xbf16>
    %c0_93 = arith.constant 0 : index
    %c12_94 = arith.constant 12 : index
    %95 = vector.load %arg12[%c0_93, %c12_94] : memref<8x122xbf16, #tpu.memory_space<vmem>>, vector<8x100xbf16>
    %cst_95 = arith.constant dense<0.000000e+00> : vector<8x100xf32>
    %96 = tpu.matmul %94, %95, %cst_95 {dimension_numbers = #tpu.dot_dimension_numbers<[1], [0], [0], [1], [0, 0, 1, 1], [], []>} : vector<8x8xbf16>, vector<8x100xbf16>, vector<8x100xf32> -> vector<8x100xf32>
    %97 = arith.addf %92, %96 : vector<8x100xf32>
    %c6_96 = arith.constant 6 : index
    %c0_97 = arith.constant 0 : index
    %c0_98 = arith.constant 0 : index
    %98 = vector.load %arg6[%c6_96, %c0_97, %c0_98] : memref<9x8x8xbf16, #tpu.memory_space<vmem>>, vector<1x8x8xbf16>
    %99 = vector.shape_cast %98 : vector<1x8x8xbf16> to vector<8x8xbf16>
    %c0_99 = arith.constant 0 : index
    %c20 = arith.constant 20 : index
    %100 = vector.load %arg12[%c0_99, %c20] : memref<8x122xbf16, #tpu.memory_space<vmem>>, vector<8x100xbf16>
    %cst_100 = arith.constant dense<0.000000e+00> : vector<8x100xf32>
    %101 = tpu.matmul %99, %100, %cst_100 {dimension_numbers = #tpu.dot_dimension_numbers<[1], [0], [0], [1], [0, 0, 1, 1], [], []>} : vector<8x8xbf16>, vector<8x100xbf16>, vector<8x100xf32> -> vector<8x100xf32>
    %102 = arith.addf %97, %101 : vector<8x100xf32>
    %c7_101 = arith.constant 7 : index
    %c0_102 = arith.constant 0 : index
    %c0_103 = arith.constant 0 : index
    %103 = vector.load %arg6[%c7_101, %c0_102, %c0_103] : memref<9x8x8xbf16, #tpu.memory_space<vmem>>, vector<1x8x8xbf16>
    %104 = vector.shape_cast %103 : vector<1x8x8xbf16> to vector<8x8xbf16>
    %c0_104 = arith.constant 0 : index
    %c21_105 = arith.constant 21 : index
    %105 = vector.load %arg12[%c0_104, %c21_105] : memref<8x122xbf16, #tpu.memory_space<vmem>>, vector<8x100xbf16>
    %cst_106 = arith.constant dense<0.000000e+00> : vector<8x100xf32>
    %106 = tpu.matmul %104, %105, %cst_106 {dimension_numbers = #tpu.dot_dimension_numbers<[1], [0], [0], [1], [0, 0, 1, 1], [], []>} : vector<8x8xbf16>, vector<8x100xbf16>, vector<8x100xf32> -> vector<8x100xf32>
    %107 = arith.addf %102, %106 : vector<8x100xf32>
    %c8_107 = arith.constant 8 : index
    %c0_108 = arith.constant 0 : index
    %c0_109 = arith.constant 0 : index
    %108 = vector.load %arg6[%c8_107, %c0_108, %c0_109] : memref<9x8x8xbf16, #tpu.memory_space<vmem>>, vector<1x8x8xbf16>
    %109 = vector.shape_cast %108 : vector<1x8x8xbf16> to vector<8x8xbf16>
    %c0_110 = arith.constant 0 : index
    %c22_111 = arith.constant 22 : index
    %110 = vector.load %arg12[%c0_110, %c22_111] : memref<8x122xbf16, #tpu.memory_space<vmem>>, vector<8x100xbf16>
    %cst_112 = arith.constant dense<0.000000e+00> : vector<8x100xf32>
    %111 = tpu.matmul %109, %110, %cst_112 {dimension_numbers = #tpu.dot_dimension_numbers<[1], [0], [0], [1], [0, 0, 1, 1], [], []>} : vector<8x8xbf16>, vector<8x100xbf16>, vector<8x100xf32> -> vector<8x100xf32>
    %112 = arith.addf %107, %111 : vector<8x100xf32>
    %c0_113 = arith.constant 0 : index
    %c0_114 = arith.constant 0 : index
    %113 = vector.load %arg8[%c0_113, %c0_114] : memref<8x1xf32, #tpu.memory_space<vmem>>, vector<8x1xf32>
    %114 = vector.broadcast %113 : vector<8x1xf32> to vector<8x100xf32>
    %115 = arith.addf %112, %114 : vector<8x100xf32>
    %c0_115 = arith.constant 0 : index
    %c0_116 = arith.constant 0 : index
    %116 = vector.load %arg10[%c0_115, %c0_116] : memref<8x4xbf16, #tpu.memory_space<vmem>>, vector<8x4xbf16>
    %c0_117 = arith.constant 0 : index
    %c0_118 = arith.constant 0 : index
    %c11_119 = arith.constant 11 : index
    %117 = vector.load %arg4[%c0_117, %c0_118, %c11_119] : memref<1x4x122xbf16, #tpu.memory_space<vmem>>, vector<1x4x100xbf16>
    %118 = vector.shape_cast %117 : vector<1x4x100xbf16> to vector<4x100xbf16>
    %cst_120 = arith.constant dense<0.000000e+00> : vector<8x100xf32>
    %119 = tpu.matmul %116, %118, %cst_120 {dimension_numbers = #tpu.dot_dimension_numbers<[1], [0], [0], [1], [0, 0, 1, 1], [], []>} : vector<8x4xbf16>, vector<4x100xbf16>, vector<8x100xf32> -> vector<8x100xf32>
    %120 = arith.addf %115, %119 : vector<8x100xf32>
    %cst_121 = arith.constant 0.000000e+00 : f32
    %121 = vector.broadcast %cst_121 : f32 to vector<8x100xf32>
    %122 = arith.maximumf %120, %121 : vector<8x100xf32>
    %c0_122 = arith.constant 0 : index
    %c0_123 = arith.constant 0 : index
    %c0_124 = arith.constant 0 : index
    %123 = vector.load %arg11[%c0_122, %c0_123, %c0_124] : memref<1x8x100xf32, #tpu.memory_space<vmem>>, vector<1x8x100xf32>
    %124 = vector.shape_cast %123 : vector<1x8x100xf32> to vector<8x100xf32>
    %125 = vector.shape_cast %122 : vector<8x100xf32> to vector<1x8x100xf32>
    tpu.vector_store %arg11[%c0_122, %c0_123, %c0_124], %125 {strides = array<i32>} : memref<1x8x100xf32, #tpu.memory_space<vmem>>, vector<1x8x100xf32>,
    return
  }
  func.func @transform_0(%arg0: i32) -> (i32, i32, i32) {
    %c0_i32 = arith.constant 0 : i32
    %c0_i32_0 = arith.constant 0 : i32
    %c0_i32_1 = arith.constant 0 : i32
    return %arg0, %c0_i32, %c0_i32_0 : i32, i32, i32
  }
  func.func @transform_1(%arg0: i32) -> (i32, i32, i32) {
    %c0_i32 = arith.constant 0 : i32
    %c0_i32_0 = arith.constant 0 : i32
    %c0_i32_1 = arith.constant 0 : i32
    return %arg0, %c0_i32, %c0_i32_0 : i32, i32, i32
  }
  func.func @transform_2(%arg0: i32) -> (i32, i32, i32) {
    %c0_i32 = arith.constant 0 : i32
    %c0_i32_0 = arith.constant 0 : i32
    %c0_i32_1 = arith.constant 0 : i32
    return %arg0, %c0_i32, %c0_i32_0 : i32, i32, i32
  }
  func.func @transform_3(%arg0: i32) -> (i32, i32, i32) {
    %c0_i32 = arith.constant 0 : i32
    %c0_i32_0 = arith.constant 0 : i32
    %c0_i32_1 = arith.constant 0 : i32
    return %arg0, %c0_i32, %c0_i32_0 : i32, i32, i32
  }
  func.func @transform_4(%arg0: i32) -> (i32, i32, i32) {
    %c0_i32 = arith.constant 0 : i32
    %c0_i32_0 = arith.constant 0 : i32
    %c0_i32_1 = arith.constant 0 : i32
    %c0_i32_2 = arith.constant 0 : i32
    return %c0_i32, %c0_i32_0, %c0_i32_1 : i32, i32, i32
  }
  func.func @transform_5(%arg0: i32) -> (i32, i32, i32) {
    %c0_i32 = arith.constant 0 : i32
    %c0_i32_0 = arith.constant 0 : i32
    %c0_i32_1 = arith.constant 0 : i32
    %c0_i32_2 = arith.constant 0 : i32
    return %c0_i32, %c0_i32_0, %c0_i32_1 : i32, i32, i32
  }
  func.func @transform_6(%arg0: i32) -> (i32, i32) {
    %c0_i32 = arith.constant 0 : i32
    %c0_i32_0 = arith.constant 0 : i32
    %c0_i32_1 = arith.constant 0 : i32
    return %c0_i32, %c0_i32_0 : i32, i32
  }
  func.func @transform_7(%arg0: i32) -> (i32, i32) {
    %c0_i32 = arith.constant 0 : i32
    %c0_i32_0 = arith.constant 0 : i32
    %c0_i32_1 = arith.constant 0 : i32
    return %c0_i32, %c0_i32_0 : i32, i32
  }
  func.func @transform_8(%arg0: i32) -> (i32, i32) {
    %c0_i32 = arith.constant 0 : i32
    %c0_i32_0 = arith.constant 0 : i32
    %c0_i32_1 = arith.constant 0 : i32
    return %c0_i32, %c0_i32_0 : i32, i32
  }
  func.func @transform_9(%arg0: i32) -> (i32, i32) {
    %c0_i32 = arith.constant 0 : i32
    %c0_i32_0 = arith.constant 0 : i32
    %c0_i32_1 = arith.constant 0 : i32
    return %c0_i32, %c0_i32_0 : i32, i32
  }
  func.func @transform_10(%arg0: i32) -> (i32, i32, i32) {
    %c0_i32 = arith.constant 0 : i32
    %c0_i32_0 = arith.constant 0 : i32
    %c0_i32_1 = arith.constant 0 : i32
    return %arg0, %c0_i32, %c0_i32_0 : i32, i32, i32
  }
}

</mosaic_0001>

<bundles_post_ra>
// kernel: tpu_custom_call.1
= control target key start
LH: loop header
LB: loop body
LE: loop exit
PB: predicated region body
PF: predicated region fallthrough
CT: control target
= control target key end

     0   :  { %15 = vsyncpa [#allocation4], 0  ;;  %s2287_s0 = inlined_call_operand.vmem [shape: bf16[2,4,122], index: 0, kind: input, shape index: {}]   ;;  %s2288_s1 = inlined_call_operand.vmem [shape: bf16[2,4,122], index: 1, kind: input, shape index: {}]   ;;  %s2289_s2 = inlined_call_operand.vmem [shape: bf16[2,4,122], index: 2, kind: input, shape index: {}]   ;;  %s2290_s3 = inlined_call_operand.vmem [shape: bf16[2,4,122], index: 3, kind: input, shape index: {}]   ;;  %s2291_s4 = inlined_call_operand.vmem [shape: bf16[9,8,4], index: 4, kind: input, shape index: {}]   ;;  %s2292_s5 = inlined_call_operand.vmem [shape: bf16[9,8,8], index: 5, kind: input, shape index: {}]   ;;  %s2293_s6 = inlined_call_operand.vmem [shape: f32[8,1], index: 6, kind: input, shape index: {}]   ;;  %s2294_s7 = inlined_call_operand.vmem [shape: f32[8,1], index: 7, kind: input, shape index: {}]   ;;  %s2295_s8 = inlined_call_operand.vmem [shape: f32[1,100], index: 8, kind: input, shape index: {}]   ;;  %s2296_s9 = inlined_call_operand.vmem [shape: bf16[8,4], index: 9, kind: input, shape index: {}]   ;;  %s2297_s10 = inlined_call_operand.hbm [shape: f32[2,8,100], index: 10, kind: output, shape index: {}]  }
   0x1   :  { %17 = vsyncpa [#allocation4 + $0x1], 0  ;;  %s2009_s13 = smov 0   ;;  %s2011_s14 = smov 0  }
   0x2   :  { %s2013_s15 = smov 0   ;;  %s2015_s16 = smov 0  }
   0x3 LB: > { %2299 = sst [smem:[#allocation6_spill]] %s1935_s15  ;;  %s2030_s17 = sadd.s32 4294967295, %s1939_s16   ;;  %s1939_s16 = sphi %s2015_s16, %s2308_s16   ;;  %s1935_s15 = sphi %s2013_s15, %s2307_s15   ;;  %s1931_s14 = sphi %s2011_s14, %s2306_s14   ;;  %s1927_s13 = sphi %s2009_s13, %s2305_s13  }
   0x4   : > { %s1611_s18 = sadd.s32 4294967294, %s1939_s16   ;;  %s2034_s19 = sadd.s32 1, %s1939_s16  }
   0x5   : > { %s260_s20 = sadd.s32 1, %s1935_s15  ;;  %s257_s21 = ssub.s32 %s1939_s16, %s2034_s19 }
   0x6   : > { %p270_p0 = scmp.ne.s32.totalorder %s1935_s15, %s1931_s14  ;;  %p258_p1 = scmp.eq.s32.totalorder %s257_s21, 0 }
   0x7   : > { %p271_p2 = scmp.eq.s32.totalorder %s2030_s17, 1  ;;  %p276_p3 = scmp.ne.s32.totalorder %s1931_s14, %s1927_s13 }
   0x8   : > { %p277_p4 = scmp.eq.s32.totalorder %s1611_s18, 1  ;;  %p1614_p7 = scmp.ge.s32.totalorder %s1939_s16, 1 }
   0x9   : > { %s2045_s22 = scalar_select %p258_p1, %s1935_s15, %s260_s20  }
   0xa   : > { %p2047_p5 = por %p271_p2, %p270_p0  ;;  %p2051_p6 = por %p277_p4, %p276_p3 }
   0xb   : > { %2300 = sst [smem:[#allocation7_spill]] %s2045_s22  ;;  %p341_p8 = scmp.lt.s32.totalorder %s1939_s16, 3 }
   0xd   : > { %p342_p9 = pnand %p1614_p7, %p341_p8 }
   0xe   : > { %p390_p10 = scmp.lt.s32.totalorder (!%p342_p9), %s2030_s17, 1  ;;  %s1943_s22 = smov (!%p342_p9), 117  }
   0xf   : > { %345 = sbr.rel (%p342_p9) target bundleno = 869 (0x365), region = 60  ;;  %s1944_s15 = smov (!%p342_p9), 116  }
  0x10   : > { %s1946_s30 = smov (!%p342_p9), 106   ;;  %s1948_s20 = smov (!%p342_p9), 11  }
  0x11   : > { %s1949_s27 = smov (!%p342_p9), 126   ;;  %s1952_s11 = smov (!%p342_p9), 108  }
  0x14   : > { %v1941_v0 = vmov 0.0   ;;  %vm1942_vm0 = vmmov 0   ;;  %s391_s25 = scalar_select %p390_p10, %s2030_s17, 1  ;;  %v946_v5 = vld [vmem:[%s2293_s6] sm:$0xff]  ;;  %v1947_v6 = vmov 0   ;;  %vm426_vm1 = vcmask 1041408  }
  0x15   : > { %1711 = vmatprep.subr.bf16.mxu0 %v1941_v0  ;;  %1713 = vmatprep.mubr.msk.bf16.mxu0 %vm1942_vm0, %v1941_v0  ;;  %v1620_v10 = vld [vmem:[%s2291_s4 + $0x4] sm:$0xf]  ;;  %vm422_vm2 = vcmask 31744   ;;  %v408_v15 = vld [vmem:[%s2291_s4] sm:$0xf]  ;;  %vm962_vm3 = vcmask 994304  }
  0x16   : > { %1717 = vmatprep.subr.bf16.mxu1 %v1941_v0  ;;  %1719 = vmatprep.mubr.msk.bf16.mxu1 %vm1942_vm0, %v1941_v0  ;;  %s1616_s26 = sshll.u32 %s391_s25, 1  ;;  %v1625_v18 = vld [vmem:[%s2291_s4 + $0x8] sm:$0xf]  ;;  %v1628_v21 = vld [vmem:[%s2291_s4 + $0xc] sm:$0xf]  ;;  %vm971_vm4 = vcmask 904280  }
  0x17   : > { %s397_s29 = scalar_lea.vmem %s2288_s1, %s1616_s26  ;;  %s393_s12 = scalar_lea.vmem %s2287_s0, %s1616_s26  ;;  %1876 = vset.pattern.permute.xlu1 %v1947_v6  ;;  %1877 = vset.pattern.permute.xlu0 %v1947_v6  ;;  %v1631_v24 = vld [vmem:[%s2291_s4 + $0x10] sm:$0xf]  ;;  %v1634_v27 = vld [vmem:[%s2291_s4 + $0x14] sm:$0xf]  ;;  %v1637_v30 = vld [vmem:[%s2291_s4 + $0x18] sm:$0xf] }
  0x18   : > { %v1621_v1 = vld.sshfl [vmem:[%s397_s29] sm:$0x3 pattern:$0x76325410]  ;;  %s401_s21 = scalar_lea.vmem %s2289_s2, %s1616_s26  ;;  %s405_s28 = scalar_lea.vmem %s2290_s3, %s1616_s26  ;;  %v1640_v32 = vld [vmem:[%s2291_s4 + $0x1c] sm:$0xf] }
  0x19   : > { %420 = vrot.lane.b32.xlu0 %v1621_v1, %s1943_s22  ;;  %v1623_v2 = vld.sshfl [vmem:[%s393_s12] sm:$0x3 pattern:$0x76325410]  ;;  %s1945_s29 = smov 107   ;;  %vm986_vm5 = vcmask 1043456  }
  0x1a   : > { %537 = vrot.lane.b32.xlu1 %v1623_v2, %s1944_s15  ;;  %v1629_v3 = vld.sshfl [vmem:[%s401_s21] sm:$0x3 pattern:$0x76325410]  ;;  %963 = vst.msk [vmem:[#allocation2] sm:$0xf] %vm962_vm3, %v1947_v6 }
  0x1b   : > { %v2081_v4 = vld.sshfl [vmem:[%s405_s28] sm:$0x3 pattern:$0x76325410]  ;;  %vm982_vm6 = vcmask 64512   ;;  %s1950_s28 = smov 127  }
  0x1c   : > { %v1643_v33 = vld [vmem:[%s2291_s4 + $0x20] sm:$0xf]  ;;  %s1951_s26 = smov 118   ;;  %vm1500_vm7 = vcmask 818176  }
  0x1d   : > { %478 = vrot.lane.b32.xlu0 %v1623_v2, %s1943_s22 }
  0x1e   : > { %597 = vrot.lane.b32.xlu1 %v1629_v3, %s1943_s22 }
  0x21   : > { %657 = vrot.lane.b32.xlu0 %v2081_v4, %s1943_s22 }
  0x22   : > { %717 = vrot.lane.b32.xlu1 %v1629_v3, %s1944_s15 }
  0x25   : > { %777 = vrot.lane.b32.xlu0 %v1623_v2, %s1945_s29 }
  0x26   : > { %837 = vrot.lane.b32.xlu1 %v1621_v1, %s1945_s29 }
  0x29   : > { %897 = vrot.lane.b32.xlu0 %v1623_v2, %s1946_s30 }
  0x2a   : > { %949 = vperm.xlu1 %1876, %v946_v5  }
  0x8b   : > { %v421_v7 = vpop.permute.xlu0 %420 }
  0x8c   : > { %v428_v8 = vsel %vm426_vm1, %v421_v7, 0  ;;  %v538_v9 = vpop.permute.xlu1 %537 }
  0x8d   : > { %1712 = vmatpush3.bf16.msra.mxu0 %v428_v8  ;;  %v543_v11 = vsel %vm426_vm1, %v538_v9, 0 }
  0x8e   : > { %1723 = vmatprep.subr.bf16.mxu0 %v1941_v0 }
  0x8f   : > { %v479_v12 = vpop.permute.xlu0 %478 }
  0x90   : > { %1714 = vmatmul.mubr.msk.bf16.vlgmr.msra.gmra.mxu0 %vm422_vm2, %v1620_v10  ;;  %v484_v13 = vsel %vm426_vm1, %v479_v12, 0  ;;  %v598_v14 = vpop.permute.xlu1 %597 }
  0x91   : > { %1718 = vmatpush3.bf16.msra.mxu1 %v484_v13  ;;  %1724 = vmatpush3.bf16.msra.mxu0 %v543_v11  ;;  %v603_v16 = vsel %vm426_vm1, %v598_v14, 0 }
  0x92   : > { %1725 = vmatprep.mubr.msk.bf16.mxu0 %vm1942_vm0, %v1941_v0  ;;  %1729 = vmatprep.subr.bf16.mxu1 %v1941_v0 }
  0x93   : > { %v658_v17 = vpop.permute.xlu0 %657  ;;  %1735 = vmatprep.subr.bf16.mxu0 %v1941_v0 }
  0x94   : > { %1720 = vmatmul.mubr.msk.bf16.vlgmr.msra.gmra.mxu1 %vm422_vm2, %v408_v15  ;;  %v663_v19 = vsel %vm426_vm1, %v658_v17, 0  ;;  %v718_v20 = vpop.permute.xlu1 %717 }
  0x95   : > { %1730 = vmatpush3.bf16.msra.mxu1 %v603_v16  ;;  %1731 = vmatprep.mubr.msk.bf16.mxu1 %vm1942_vm0, %v1941_v0  ;;  %v723_v22 = vsel %vm426_vm1, %v718_v20, 0  ;;  %v1646_v16 = vld [vmem:[%s2295_s8] ss:$0 sm:$0xff] }
  0x96   : > { %1741 = vmatprep.subr.bf16.mxu1 %v1941_v0 }
  0x97   : > { %v778_v23 = vpop.permute.xlu0 %777 }
  0x98   : > { %1726 = vmatmul.mubr.msk.bf16.vlgmr.msra.gmra.mxu0 %vm422_vm2, %v1625_v18  ;;  %v783_v25 = vsel %vm426_vm1, %v778_v23, 0  ;;  %v838_v26 = vpop.permute.xlu1 %837 }
  0x99   : > { %1736 = vmatpush3.bf16.msra.mxu0 %v663_v19  ;;  %1737 = vmatprep.mubr.msk.bf16.mxu0 %vm1942_vm0, %v1941_v0  ;;  %v843_v28 = vsel %vm426_vm1, %v838_v26, 0  ;;  %v973_v26 = vld [vmem:[%s2292_s5] sm:$0xf] }
  0x9a   : > { %1747 = vmatprep.subr.bf16.mxu0 %v1941_v0 }
  0x9b   : > { %v898_v29 = vpop.permute.xlu0 %897 }
  0x9c   : > { %1732 = vmatmul.mubr.msk.bf16.vlgmr.msra.gmra.mxu1 %vm422_vm2, %v1628_v21  ;;  %v903_v31 = vsel %vm426_vm1, %v898_v29, 0 }
  0x9d   : > { %1742 = vmatpush3.bf16.msra.mxu1 %v723_v22  ;;  %1743 = vmatprep.mubr.msk.bf16.mxu1 %vm1942_vm0, %v1941_v0 }
  0x9e   : > { %1753 = vmatprep.subr.bf16.mxu1 %v1941_v0 }
  0xa0   : > { %1738 = vmatmul.mubr.msk.bf16.vlgmr.msra.gmra.mxu0 %vm422_vm2, %v1631_v24 }
  0xa1   : > { %1748 = vmatpush3.bf16.msra.mxu0 %v783_v25  ;;  %1749 = vmatprep.mubr.msk.bf16.mxu0 %vm1942_vm0, %v1941_v0 }
  0xa2   : > { %1759 = vmatprep.subr.bf16.mxu0 %v1941_v0 }
  0xa4   : > { %1744 = vmatmul.mubr.msk.bf16.vlgmr.msra.gmra.mxu1 %vm422_vm2, %v1634_v27  ;;  %v1433_v27 = vld [vmem:[%s2294_s7] sm:$0xff] }
  0xa5   : > { %1754 = vmatpush3.bf16.msra.mxu1 %v843_v28  ;;  %1755 = vmatprep.mubr.msk.bf16.mxu1 %vm1942_vm0, %v1941_v0  ;;  %v950_v9 = vpop.permute.xlu1 %949 }
  0xa6   : > { %1765 = vmatprep.subr.bf16.mxu1 %v1941_v0 }
  0xa8   : > { %1750 = vmatmul.mubr.msk.bf16.vlgmr.msra.gmra.mxu0 %vm422_vm2, %v1637_v30 }
  0xa9   : > { %1760 = vmatpush3.bf16.msra.mxu0 %v903_v31  ;;  %1761 = vmatprep.mubr.msk.bf16.mxu0 %vm1942_vm0, %v1941_v0  ;;  %v1648_v31 = vld [vmem:[%s2292_s5 + $0x4] sm:$0xf] }
  0xaa   : > { %1771 = vmatprep.subr.bf16.mxu0 %v1941_v0 }
  0xac   : > { %1756 = vmatmul.mubr.msk.bf16.vlgmr.msra.gmra.mxu1 %vm422_vm2, %v1640_v32 }
  0xad   : > { %1767 = vmatprep.mubr.msk.bf16.mxu1 %vm1942_vm0, %v1941_v0 }
  0xb0   : > { %1762 = vmatmul.mubr.msk.bf16.vlgmr.msra.gmra.mxu0 %vm422_vm2, %v1643_v33 }
  0xb1   : > { %1773 = vmatprep.mubr.msk.bf16.mxu0 %vm1942_vm0, %v1941_v0 }
 0x150   : > { %v464_v34 = vpop.f32.mrf.mxu0 }
 0x152   : > { %v1715_v35 = vpop.f32.mrf.mxu0 }
 0x154   : > { %v467_v36 = vpop.f32.mrf.mxu0  ;;  %v520_v37 = vpop.f32.mrf.mxu1 }
 0x155   : > { %v521_v52 = vadd.f32 %v520_v37, %v464_v34  ;;  %v1654_v34 = vld [vmem:[%s2292_s5 + $0xc] sm:$0xf] }
 0x156   : > { %v1716_v38 = vpop.f32.mrf.mxu0  ;;  %v1721_v39 = vpop.f32.mrf.mxu1 }
 0x157   : > { %v1652_v38 = vld [vmem:[%s2292_s5 + $0x8] sm:$0xf] }
 0x158   : > { %v523_v40 = vpop.f32.mrf.mxu1  ;;  %v579_v41 = vpop.f32.mrf.mxu0 }
 0x159   : > { %v585_v55 = vadd.f32 %v579_v41, %v521_v52  ;;  %v1658_v41 = vld [vmem:[%s2292_s5 + $0x14] sm:$0xf]  ;;  %v1440_v52 = vld [vmem:[%s2296_s9] sm:$0xf] }
 0x15a   : > { %v1722_v42 = vpop.f32.mrf.mxu1  ;;  %v1727_v43 = vpop.f32.mrf.mxu0 }
 0x15c   : > { %v582_v44 = vpop.f32.mrf.mxu0  ;;  %v639_v45 = vpop.f32.mrf.mxu1 }
 0x15d   : > { %v645_v58 = vadd.f32 %v639_v45, %v585_v55  ;;  %v1656_v44 = vld [vmem:[%s2292_s5 + $0x10] sm:$0xf] }
 0x15e   : > { %v1728_v46 = vpop.f32.mrf.mxu0  ;;  %v1733_v47 = vpop.f32.mrf.mxu1 }
 0x15f   : > { %v1662_v47 = vld [vmem:[%s2292_s5 + $0x1c] sm:$0xf] }
 0x160   : > { %v642_v48 = vpop.f32.mrf.mxu1  ;;  %v699_v49 = vpop.f32.mrf.mxu0 }
 0x161   : > { %v705_v61 = vadd.f32 %v699_v49, %v645_v58 }
 0x162   : > { %v1734_v50 = vpop.f32.mrf.mxu1  ;;  %v1739_v51 = vpop.f32.mrf.mxu0 }
 0x163   : > { %v1660_v50 = vld [vmem:[%s2292_s5 + $0x18] sm:$0xf] }
 0x164   : > { %v702_v53 = vpop.f32.mrf.mxu0  ;;  %v759_v54 = vpop.f32.mrf.mxu1 }
 0x165   : > { %v765_v1 = vadd.f32 %v759_v54, %v705_v61  ;;  %v1664_v53 = vld [vmem:[%s2292_s5 + $0x20] sm:$0xf] }
 0x166   : > { %v1740_v56 = vpop.f32.mrf.mxu0  ;;  %v1745_v57 = vpop.f32.mrf.mxu1 }
 0x168   : > { %v762_v59 = vpop.f32.mrf.mxu1  ;;  %v819_v60 = vpop.f32.mrf.mxu0 }
 0x169   : > { %v825_v5 = vadd.f32 %v819_v60, %v765_v1 }
 0x16a   : > { %v1746_v62 = vpop.f32.mrf.mxu1  ;;  %v1751_v63 = vpop.f32.mrf.mxu0 }
 0x16c   : > { %v822_v2 = vpop.f32.mrf.mxu0  ;;  %v879_v3 = vpop.f32.mrf.mxu1 }
 0x16d   : > { %v885_v8 = vadd.f32 %v879_v3, %v825_v5 }
 0x16e   : > { %v1752_v6 = vpop.f32.mrf.mxu0  ;;  %v1757_v7 = vpop.f32.mrf.mxu1 }
 0x170   : > { %v882_v10 = vpop.f32.mrf.mxu1  ;;  %v939_v11 = vpop.f32.mrf.mxu0 }
 0x171   : > { %v945_v12 = vadd.f32 %v939_v11, %v885_v8 }
 0x172   : > { %v1758_v13 = vpop.f32.mrf.mxu1  ;;  %v1763_v14 = vpop.f32.mrf.mxu0 }
 0x173   : > { %v952_v15 = vadd.f32 %v950_v9, %v945_v12 }
 0x174   : > { %v942_v17 = vpop.f32.mrf.mxu0 }
 0x175   : > { %v953_v18 = vmax.f32 %v952_v15, 0.0 }
 0x176   : > { %v1764_v19 = vpop.f32.mrf.mxu0 }
 0x177   : > { %v961_v20 = vmul.f32 %v1646_v16, %v953_v18 }
 0x179   : > { %v1672_v21 = vpack.c.bf16 %v961_v20, %v961_v20 }
 0x17b   : > { %968 = vrot.lane.b32.xlu0 %v1672_v21, %s1948_s20 }
 0x1ed   : > { %v969_v22 = vpop.permute.xlu0 %968 }
 0x1ee   : > { %972 = vst.msk [vmem:[#allocation2] sm:$0xf] %vm971_vm4, %v969_v22 }
 0x1f5   : > { %v974_v23 = vld [vmem:[#allocation2] sm:$0xf] }
 0x1f6   : > { %v1649_v24 = vcombine.low %v974_v23, %v974_v23  ;;  %v1034_v25 = vsel %vm986_vm5, %v974_v23, 0 }
 0x1f7   : > { %1772 = vmatpush3.bf16.msra.mxu0 %v1034_v25 }
 0x1f8   : > { %1078 = vrot.lane.b32.xlu0 %v1649_v24, %s1949_s27  ;;  %980 = vrot.lane.b32.xlu1 %v1649_v24, %s1950_s28  ;;  %s1669_s27 = sshll.u32 %s2030_s17, 7 }
 0x1f9   : > { %1783 = vmatprep.subr.bf16.mxu0 %v1941_v0  ;;  %s1514_s18 = scalar_lea.hbm %s2297_s10, %s1669_s27 }
 0x1fa   : > { %1774 = vmatmul.mubr.msk.bf16.vlgmr.msra.gmra.mxu0 %vm982_vm6, %v973_v26 }
 0x1fb   : > { %1785 = vmatprep.mubr.msk.bf16.mxu0 %vm1942_vm0, %v1941_v0 }
 0x1fc   : > { %1180 = vrot.lane.b32.xlu0 %v1649_v24, %s1943_s22  ;;  %1129 = vrot.lane.b32.xlu1 %v1649_v24, %s1951_s26 }
 0x200   : > { %1282 = vrot.lane.b32.xlu0 %v1649_v24, %s1952_s11  ;;  %1231 = vrot.lane.b32.xlu1 %v1649_v24, %s1944_s15  ;;  %s1953_s15 = smov [#allocation3]  }
 0x201   : > { %s1883_s17 = sshll.u32 %s1953_s15, 4  ;;  %s1884_s17 = int_to_ptr.vmem [resolvable:$false] %s1883_s17 }
 0x204   : > { %1384 = vrot.lane.b32.xlu0 %v1649_v24, %s1946_s30  ;;  %1333 = vrot.lane.b32.xlu1 %v1649_v24, %s1945_s29  ;;  %s387_s30 = sand.u32 1, %s1931_s14  }
 0x205   : > { %s1615_s25 = sshll.u32 %s387_s30, 3  ;;  %s1503_s20 = scalar_lea.sflag [#allocation4], %s387_s30 }
 0x206   : > { %s389_s28 = scalar_lea.vmem [#allocation3], %s1615_s25 }
 0x207   : > { %s1516_s26 = sshll.u32 %s389_s28, 4  ;;  %s1517_s26 = int_to_ptr.vmem [resolvable:$true] %s1516_s26 }
 0x208   : > { %1450 = vrot.lane.b32.xlu1 %v2081_v4, %s1943_s22  ;;  %1436 = vperm.xlu0 %1877, %v1433_v27   ;;  %s1879_s21 = scalar_lea.vmem %s1517_s26, 128  ;;  %s1885_s22 = scalar_lea.vmem %s1884_s17, 256 }
 0x209   : > { %p1880_p11 = scmp.ne.s32.totalorder %s1517_s26, %s1879_s21  ;;  %p1886_p0 = scmp.lt.s32.totalorder %s1517_s26, %s1884_s17 }
 0x20a   : > { %p1887_p1 = scmp.lt.s32.totalorder %s1885_s22, %s1879_s21 }
 0x20b   : > { %p1881_p12 = pnand %p1880_p11, %p2047_p5 }
 0x20c   : > { %p1888_p2 = por %p1887_p1, %p1886_p0 }
 0x20d   : > { %p1882_p13 = pneg %p1881_p12 }
 0x20f   : > { %p1889_p3 = pnand %p1888_p2, %p1882_p13 }
 0x26a   : > { %v981_v28 = vpop.permute.xlu1 %980  ;;  %v1079_v30 = vpop.permute.xlu0 %1078 }
 0x26b   : > { %v988_v29 = vsel %vm986_vm5, %v981_v28, 0  ;;  %v1084_v33 = vsel %vm986_vm5, %v1079_v30, 0 }
 0x26c   : > { %1766 = vmatpush3.bf16.msra.mxu1 %v988_v29 }
 0x26d   : > { %1777 = vmatprep.subr.bf16.mxu1 %v1941_v0 }
 0x26e   : > { %v1130_v32 = vpop.permute.xlu1 %1129  ;;  %v1181_v37 = vpop.permute.xlu0 %1180 }
 0x26f   : > { %v1135_v4 = vsel %vm986_vm5, %v1130_v32, 0  ;;  %1768 = vmatmul.mubr.msk.bf16.vlgmr.msra.gmra.mxu1 %vm982_vm6, %v1648_v31  ;;  %v1186_v39 = vsel %vm986_vm5, %v1181_v37, 0 }
 0x270   : > { %1778 = vmatpush3.bf16.msra.mxu1 %v1084_v33  ;;  %1784 = vmatpush3.bf16.msra.mxu0 %v1135_v4 }
 0x271   : > { %1795 = vmatprep.subr.bf16.mxu0 %v1941_v0  ;;  %1779 = vmatprep.mubr.msk.bf16.mxu1 %vm1942_vm0, %v1941_v0 }
 0x272   : > { %v1232_v35 = vpop.permute.xlu1 %1231  ;;  %1789 = vmatprep.subr.bf16.mxu1 %v1941_v0  ;;  %v1283_v43 = vpop.permute.xlu0 %1282 }
 0x273   : > { %v1237_v36 = vsel %vm986_vm5, %v1232_v35, 0  ;;  %1786 = vmatmul.mubr.msk.bf16.vlgmr.msra.gmra.mxu0 %vm982_vm6, %v1654_v34  ;;  %v1288_v46 = vsel %vm986_vm5, %v1283_v43, 0 }
 0x274   : > { %1796 = vmatpush3.bf16.msra.mxu0 %v1237_v36  ;;  %1797 = vmatprep.mubr.msk.bf16.mxu0 %vm1942_vm0, %v1941_v0 }
 0x275   : > { %1807 = vmatprep.subr.bf16.mxu0 %v1941_v0 }
 0x276   : > { %v1334_v40 = vpop.permute.xlu1 %1333  ;;  %v1385_v49 = vpop.permute.xlu0 %1384 }
 0x277   : > { %1780 = vmatmul.mubr.msk.bf16.vlgmr.msra.gmra.mxu1 %vm982_vm6, %v1652_v38  ;;  %v1339_v42 = vsel %vm986_vm5, %v1334_v40, 0  ;;  %v1390_v51 = vsel %vm986_vm5, %v1385_v49, 0 }
 0x278   : > { %1790 = vmatpush3.bf16.msra.mxu1 %v1186_v39  ;;  %1791 = vmatprep.mubr.msk.bf16.mxu1 %vm1942_vm0, %v1941_v0 }
 0x279   : > { %1801 = vmatprep.subr.bf16.mxu1 %v1941_v0 }
 0x27a   : > { %v1451_v45 = vpop.permute.xlu1 %1450 }
 0x27b   : > { %1798 = vmatmul.mubr.msk.bf16.vlgmr.msra.gmra.mxu0 %vm982_vm6, %v1658_v41  ;;  %v1456_v48 = vsel %vm426_vm1, %v1451_v45, 0 }
 0x27c   : > { %1808 = vmatpush3.bf16.msra.mxu0 %v1339_v42  ;;  %1809 = vmatprep.mubr.msk.bf16.mxu0 %vm1942_vm0, %v1941_v0 }
 0x27d   : > { %1819 = vmatprep.subr.bf16.mxu0 %v1941_v0 }
 0x27f   : > { %1792 = vmatmul.mubr.msk.bf16.vlgmr.msra.gmra.mxu1 %vm982_vm6, %v1656_v44 }
 0x280   : > { %1802 = vmatpush3.bf16.msra.mxu1 %v1288_v46  ;;  %1803 = vmatprep.mubr.msk.bf16.mxu1 %vm1942_vm0, %v1941_v0 }
 0x281   : > { %1813 = vmatprep.subr.bf16.mxu1 %v1941_v0 }
 0x283   : > { %1810 = vmatmul.mubr.msk.bf16.vlgmr.msra.gmra.mxu0 %vm982_vm6, %v1662_v47  ;;  %v1437_v32 = vpop.permute.xlu0 %1436 }
 0x284   : > { %1820 = vmatpush3.bf16.msra.mxu0 %v1456_v48  ;;  %1821 = vmatprep.mubr.msk.bf16.mxu0 %vm1942_vm0, %v1941_v0 }
 0x287   : > { %1804 = vmatmul.mubr.msk.bf16.vlgmr.msra.gmra.mxu1 %vm982_vm6, %v1660_v50 }
 0x288   : > { %1814 = vmatpush3.bf16.msra.mxu1 %v1390_v51  ;;  %1815 = vmatprep.mubr.msk.bf16.mxu1 %vm1942_vm0, %v1941_v0 }
 0x28b   : > { %1822 = vmatmul.mubr.msk.bf16.vlgmr.msra.gmra.mxu0 %vm422_vm2, %v1440_v52 }
 0x28f   : > { %1816 = vmatmul.mubr.msk.bf16.vlgmr.msra.gmra.mxu1 %vm982_vm6, %v1664_v53 }
 0x2ba   : > { %v1070_v54 = vpop.f32.mrf.mxu0 }
 0x2bc   : > { %v1775_v55 = vpop.f32.mrf.mxu0 }
 0x2be   : > { %v1073_v56 = vpop.f32.mrf.mxu0 }
 0x2c0   : > { %v1776_v57 = vpop.f32.mrf.mxu0 }
 0x32f   : > { %v1024_v58 = vpop.f32.mrf.mxu1 }
 0x330   : > { %v1071_v7 = vadd.f32 %v1070_v54, %v1024_v58 }
 0x331   : > { %v1769_v59 = vpop.f32.mrf.mxu1 }
 0x333   : > { %v1027_v60 = vpop.f32.mrf.mxu1  ;;  %v1171_v0 = vpop.f32.mrf.mxu0 }
 0x335   : > { %v1770_v61 = vpop.f32.mrf.mxu1  ;;  %v1787_v62 = vpop.f32.mrf.mxu0 }
 0x337   : > { %v1120_v63 = vpop.f32.mrf.mxu1  ;;  %v1174_v1 = vpop.f32.mrf.mxu0 }
 0x338   : > { %v1126_v10 = vadd.f32 %v1120_v63, %v1071_v7 }
 0x339   : > { %v1781_v2 = vpop.f32.mrf.mxu1  ;;  %v1788_v3 = vpop.f32.mrf.mxu0 }
 0x33a   : > { %v1177_v15 = vadd.f32 %v1171_v0, %v1126_v10 }
 0x33b   : > { %v1123_v5 = vpop.f32.mrf.mxu1  ;;  %v1273_v6 = vpop.f32.mrf.mxu0 }
 0x33d   : > { %v1782_v8 = vpop.f32.mrf.mxu1  ;;  %v1799_v9 = vpop.f32.mrf.mxu0 }
 0x33f   : > { %v1222_v11 = vpop.f32.mrf.mxu1  ;;  %v1276_v12 = vpop.f32.mrf.mxu0 }
 0x340   : > { %v1228_v18 = vadd.f32 %v1222_v11, %v1177_v15 }
 0x341   : > { %v1793_v13 = vpop.f32.mrf.mxu1  ;;  %v1800_v14 = vpop.f32.mrf.mxu0 }
 0x342   : > { %v1279_v23 = vadd.f32 %v1273_v6, %v1228_v18 }
 0x343   : > { %v1225_v16 = vpop.f32.mrf.mxu1  ;;  %v1375_v17 = vpop.f32.mrf.mxu0 }
 0x345   : > { %v1794_v19 = vpop.f32.mrf.mxu1  ;;  %v1811_v20 = vpop.f32.mrf.mxu0 }
 0x347   : > { %v1324_v21 = vpop.f32.mrf.mxu1  ;;  %v1378_v22 = vpop.f32.mrf.mxu0 }
 0x348   : > { %v1330_v26 = vadd.f32 %v1324_v21, %v1279_v23 }
 0x349   : > { %v1805_v24 = vpop.f32.mrf.mxu1  ;;  %v1812_v25 = vpop.f32.mrf.mxu0 }
 0x34a   : > { %v1381_v31 = vadd.f32 %v1375_v17, %v1330_v26 }
 0x34b   : > { %v1327_v27 = vpop.f32.mrf.mxu1  ;;  %v1492_v28 = vpop.f32.mrf.mxu0 }
 0x34d   : > { %v1806_v29 = vpop.f32.mrf.mxu1  ;;  %v1823_v30 = vpop.f32.mrf.mxu0 }
 0x34f   : > { %v1426_v33 = vpop.f32.mrf.mxu1  ;;  %v1495_v4 = vpop.f32.mrf.mxu0 }
 0x350   : > { %v1432_v34 = vadd.f32 %v1426_v33, %v1381_v31 }
 0x351   : > { %v1817_v35 = vpop.f32.mrf.mxu1  ;;  %v1824_v36 = vpop.f32.mrf.mxu0 }
 0x352   : > { %v1439_v37 = vadd.f32 %v1437_v32, %v1432_v34 }
 0x353   : > { %v1429_v38 = vpop.f32.mrf.mxu1 }
 0x354   : > { %v1498_v39 = vadd.f32 %v1492_v28, %v1439_v37 }
 0x355   : > { %v1818_v40 = vpop.f32.mrf.mxu1 }
 0x356   : > { %v1499_v41 = vmax.f32 %v1498_v39, 0.0 }
 0x358   : > { %1501 = vst.msk [vmem:[%s389_s28] sm:$0xff] %vm1500_vm7, %v1499_v41 }
 0x359   : > { %1892 = shalt.err (!%p1889_p3)
}
 0x35a   : > { %s1893_s29 = scalar_lea.hbm %s1514_s18, 128  ;;  %s1897_s27 = scalar_lea.hbm %s2297_s10, 256 }
 0x35b   : > { %p1894_p4 = scmp.ne.s32.totalorder %s1514_s18, %s1893_s29  ;;  %p1898_p9 = scmp.lt.s32.totalorder %s1514_s18, %s2297_s10 }
 0x35c   : > { %p1899_p10 = scmp.lt.s32.totalorder %s1897_s27, %s1893_s29 }
 0x35d   : > { %p1895_p7 = pnand %p1894_p4, %p2047_p5 }
 0x35e   : > { %p1900_p11 = por %p1899_p10, %p1898_p9 }
 0x35f   : > { %p1896_p8 = pneg %p1895_p7 }
 0x361   : > { %p1901_p12 = pnand %p1900_p11, %p1896_p8 }
 0x363   : > { %1904 = shalt.err (!%p1901_p12)
}
 0x364   : > { %1825 = dma.vmem_to_hbm [thread:$0]  (%p2047_p5), %s1517_s26, 128, %s1514_s18, %s1503_s20  }
 0x365 PF: > { %p1831_p13 = scmp.ge.s32.totalorder %s1939_s16, 2  ;;  %s1528_s12 = sand.u32 1, %s1927_s13  }
 0x366   : > { %s1529_s21 = scalar_lea.sflag [#allocation4], %s1528_s12 }
 0x367   : > { %p1828_p0 = pnand %p1831_p13, %p2051_p6 }
 0x369   : > { %p1829_p1 = pneg %p1828_p0 }
 0x36b   : > { %1922 = dma.done.wait (%p1829_p1), %s1529_s21, 128  }
 0x36c   : > { %1924 = vsyncadd (%p1829_p1), %s1529_s21, 4294967168  ;;  %s2303_s15 = sld [smem:[#allocation6_spill]]  ;;  %p20_p2 = scmp.ge.s32.totalorder %s2034_s19, 4  }
 0x36d   : > { %s2304_s17 = sld [smem:[#allocation7_spill]]  ;;  %s2305_s13 = smov %s1931_s14 }
 0x36e   : > { %s2308_s16 = smov %s2034_s19 }
 0x36f   :  { %22 = sbr.rel (!%p20_p2) target bundleno = 3 (0x3), region = 120 }
 0x372   : > { %s2306_s14 = smov %s2303_s15 }
 0x373   : > { %s2307_s15 = smov %s2304_s17 }
 0x374   :  { %1534 = vsyncpa [#allocation4], 1 }
 0x375   :  { %1536 = vsyncpa [#allocation4 + $0x1], 1 }

</bundles_post_ra>
